<compile_context>
chip_gen: v5e
topology: v5e:2x2
jax: 0.10.0
libtpu: 0.0.40
codegen_flags: <defaults>
</compile_context>

<pallas_src>
import jax
import jax.numpy as jnp
from jax import lax
from jax.experimental import pallas as pl
from jax.experimental.pallas import tpu as pltpu

K_IN = 784
H = 256


def _cdiv(a, b):
    return -(-a // b)


def _leaky_relu(x, slope=0.2):
    return jnp.where(x >= 0, x, slope * x)


def _choose_tile_b(b, tile_b_max):
    """Batch-tile heuristic.

    Tiny batches run as one exact-fit tile (block dims == array dims, always
    layout-legal).  Larger batches use 128-aligned tiles so the (1, tb) output
    blocks are lane-dense / unmasked; the score trades padded-row MXU work
    against per-step grid overhead (~0.35us ~= 128 row-equivalents)."""
    if b <= 256:
        return b
    tile_b_max = max(128, (tile_b_max // 128) * 128)
    candidates = [c for c in (4096, 2048, 1024, 512, 256, 128) if c <= tile_b_max]

    def score(c):
        steps = _cdiv(b, c)
        return steps * c + steps * 128

    tb = min(candidates, key=lambda c: (score(c), -c))
    # v7x megacore: make sure a sizable batch spans >= 2 (parallel) grid steps.
    if _cdiv(b, tb) == 1 and tb >= 256:
        tb //= 2
    return tb


def discriminator_kernel(x_ref, w1_ref, b1_ref, w2_ref, b2_ref, w3_ref, b3_ref,
                         logit_ref, prob_ref):
    # x tile (tb, 784) arrives as f32; cast to bf16 in VMEM (cheap VPU work
    # hidden under the x DMA).  Matmuls run bf16 on the MXU, accumulate f32.
    x = x_ref[...].astype(jnp.bfloat16)

    # fc1 + LeakyReLU (f32 epilogue)
    h = jnp.dot(x, w1_ref[...], preferred_element_type=jnp.float32)
    h = _leaky_relu(h + b1_ref[...])

    # fc2 + LeakyReLU
    h = jnp.dot(h.astype(jnp.bfloat16), w2_ref[...],
                preferred_element_type=jnp.float32)
    h = _leaky_relu(h + b2_ref[...])

    # fc3 head (256 -> 1), produced lane-dense as a (1, tb) row:
    # contract the 256-dim of w3 (1, 256) with the 256-dim of h (tb, 256).
    logit = lax.dot_general(w3_ref[...], h, (((1,), (1,)), ((), ())),
                            preferred_element_type=jnp.float32)
    logit = logit + b3_ref[...]

    logit_ref[...] = logit
    prob_ref[...] = jax.nn.sigmoid(logit)


def mnist_discriminator(x, params, *, tile_b=2048):
    """x: any array whose trailing dims flatten to 784 (e.g. (B, 1, 28, 28)).

    Returns (logit, prob), each of shape (B,) -- matching the PyTorch module."""
    (w1, b1), (w2, b2), (w3, b3) = params
    x2d = x.reshape(-1, K_IN)          # free reshape: no pad, no cast, no copy
    B = x2d.shape[0]

    tb = _choose_tile_b(B, tile_b)
    grid = (_cdiv(B, tb),)

    # Small parameter tensors: weights in bf16 (native MXU rate), biases and
    # the lane-dense head row in f32.  Fetched once, VMEM-resident thereafter.
    w1b = w1.astype(jnp.bfloat16)
    w2b = w2.astype(jnp.bfloat16)
    w3r = w3.reshape(1, H).astype(jnp.float32)
    b1r = b1.reshape(1, H).astype(jnp.float32)
    b2r = b2.reshape(1, H).astype(jnp.float32)
    b3r = b3.reshape(1, 1).astype(jnp.float32)

    resident = lambda i: (0, 0)        # constant index_map: resident weights

    cost = pl.CostEstimate(
        flops=2 * B * (K_IN * H + H * H + H),
        transcendentals=B,
        bytes_accessed=(B * K_IN * x2d.dtype.itemsize      # x stream
                        + (K_IN * H + H * H) * 2           # w1, w2 (bf16)
                        + (3 * H + 1) * 4                  # w3, b1, b2, b3
                        + 2 * B * 4),                      # logit + prob
    )

    logit2d, prob2d = pl.pallas_call(
        discriminator_kernel,
        grid=grid,
        in_specs=[
            pl.BlockSpec((tb, K_IN), lambda i: (i, 0)),    # x: streamed batch tile
            pl.BlockSpec((K_IN, H), resident),             # w1 (bf16, resident)
            pl.BlockSpec((1, H), resident),                # b1
            pl.BlockSpec((H, H), resident),                # w2 (bf16, resident)
            pl.BlockSpec((1, H), resident),                # b2
            pl.BlockSpec((1, H), resident),                # w3 (lane-dense head row)
            pl.BlockSpec((1, 1), resident),                # b3
        ],
        out_specs=(
            pl.BlockSpec((1, tb), lambda i: (0, i)),       # logit row (lane-dense)
            pl.BlockSpec((1, tb), lambda i: (0, i)),       # prob row  (lane-dense)
        ),
        out_shape=(
            jax.ShapeDtypeStruct((1, B), jnp.float32),
            jax.ShapeDtypeStruct((1, B), jnp.float32),
        ),
        compiler_params=pltpu.CompilerParams(
            dimension_semantics=("parallel",),
            # ~25 MB needed at tb=2048 (double-buffered f32 x tile + temps +
            # resident weights); 48 MiB fits every chip and lifts v5e's 16 MiB
            # default scoped limit.
            vmem_limit_bytes=48 * 1024 * 1024,
        ),
        cost_estimate=cost,
    )(x2d, w1b, b1r, w2b, b2r, w3r, b3r)

    return logit2d[0], prob2d[0]


def init_params(key):
    """Deterministic init mirroring torch.nn.Linear default U(-1/sqrt(fan_in), +).

    Weights stored pre-transposed as (in, out); biases as (1, out)."""
    dim_list = [K_IN, H, H, 1]
    params = []
    for fan_in, fan_out in zip(dim_list, dim_list[1:]):
        key, kw, kb = jax.random.split(key, 3)
        bound = 1.0 / jnp.sqrt(fan_in)
        w = jax.random.uniform(kw, (fan_in, fan_out), jnp.float32, -bound, bound)
        b = jax.random.uniform(kb, (1, fan_out), jnp.float32, -bound, bound)
        params.append((w, b))
    return params


def _reference(x, params):
    """Full-f32 reference (module semantics)."""
    (w1, b1), (w2, b2), (w3, b3) = params
    h = x.reshape(-1, K_IN).astype(jnp.float32)
    h = _leaky_relu(h @ w1 + b1)
    h = _leaky_relu(h @ w2 + b2)
    logit = (h @ w3 + b3).reshape(-1)
    return logit, jax.nn.sigmoid(logit)


if __name__ == "__main__":
    key = jax.random.PRNGKey(0)
    key, kx = jax.random.split(key)
    params = init_params(key)

    # Small MNIST-like batch: (B=2, C=1, H=28, W=28) NCHW, as in the PyTorch module.
    x = jax.random.normal(kx, (2, 1, 28, 28), jnp.float32)
    logit, prob = mnist_discriminator(x, params)
    jax.block_until_ready((logit, prob))

    ref_logit, ref_prob = _reference(x, params)
    assert logit.shape == (2,) and prob.shape == (2,)
    # bf16 matmuls with f32 accumulation: tolerances relaxed vs. pure f32.
    assert jnp.allclose(logit, ref_logit, atol=2e-2, rtol=2e-2)
    assert jnp.allclose(prob, ref_prob, atol=1e-2, rtol=1e-2)

    # Larger, non-tile-aligned batch: exercises the multi-tile path and the
    # masked ragged edge block (no wrapper-side padding).
    key, kx2 = jax.random.split(key)
    x2 = jax.random.normal(kx2, (300, K_IN), jnp.float32)
    logit2, prob2 = mnist_discriminator(x2, params)
    jax.block_until_ready((logit2, prob2))

    ref_logit2, ref_prob2 = _reference(x2, params)
    assert logit2.shape == (300,) and prob2.shape == (300,)
    assert jnp.allclose(logit2, ref_logit2, atol=5e-2, rtol=5e-2)
    assert jnp.allclose(prob2, ref_prob2, atol=2e-2, rtol=2e-2)

    print("KERNEL_OK")
</pallas_src>

<mosaic_0001>
module attributes {stable_mosaic.version = 11 : i64} {
  func.func @discriminator_kernel(%arg0: i32, %arg1: memref<2x784xf32, #tpu.memory_space<vmem>>, %arg2: memref<784x256xbf16, #tpu.memory_space<vmem>>, %arg3: memref<1x256xf32, #tpu.memory_space<vmem>>, %arg4: memref<256x256xbf16, #tpu.memory_space<vmem>>, %arg5: memref<1x256xf32, #tpu.memory_space<vmem>>, %arg6: memref<1x256xf32, #tpu.memory_space<vmem>>, %arg7: memref<1x1xf32, #tpu.memory_space<vmem>>, %arg8: memref<1x2xf32, #tpu.memory_space<vmem>>, %arg9: memref<1x2xf32, #tpu.memory_space<vmem>>) attributes {dimension_semantics = [#tpu.dimension_semantics<parallel>], iteration_bounds = array<i64: 1>, scalar_prefetch = 0 : i64, scratch_operands = 0 : i64, tpu.core_type = #tpu.core_type<tc>, window_params = [{transform_indices = @transform_0, window_bounds = array<i64: 2, 784>}, {pipeline_mode = #tpu.pipeline_mode<synchronous>, transform_indices = @transform_1, window_bounds = array<i64: 784, 256>}, {pipeline_mode = #tpu.pipeline_mode<synchronous>, transform_indices = @transform_2, window_bounds = array<i64: 1, 256>}, {pipeline_mode = #tpu.pipeline_mode<synchronous>, transform_indices = @transform_3, window_bounds = array<i64: 256, 256>}, {pipeline_mode = #tpu.pipeline_mode<synchronous>, transform_indices = @transform_4, window_bounds = array<i64: 1, 256>}, {pipeline_mode = #tpu.pipeline_mode<synchronous>, transform_indices = @transform_5, window_bounds = array<i64: 1, 256>}, {pipeline_mode = #tpu.pipeline_mode<synchronous>, transform_indices = @transform_6, window_bounds = array<i64: 1, 1>}, {transform_indices = @transform_7, window_bounds = array<i64: 1, 2>}, {transform_indices = @transform_8, window_bounds = array<i64: 1, 2>}]} {
    %c0 = arith.constant 0 : index
    %c0_0 = arith.constant 0 : index
    %0 = vector.load %arg1[%c0, %c0_0] : memref<2x784xf32, #tpu.memory_space<vmem>>, vector<2x784xf32>
    %1 = arith.truncf %0 : vector<2x784xf32> to vector<2x784xbf16>
    %c0_1 = arith.constant 0 : index
    %c0_2 = arith.constant 0 : index
    %2 = vector.load %arg2[%c0_1, %c0_2] : memref<784x256xbf16, #tpu.memory_space<vmem>>, vector<784x256xbf16>
    %cst = arith.constant dense<0.000000e+00> : vector<2x256xf32>
    %3 = tpu.matmul %1, %2, %cst {dimension_numbers = #tpu.dot_dimension_numbers<[1], [0], [0], [1], [0, 0, 1, 1], [], []>} : vector<2x784xbf16>, vector<784x256xbf16>, vector<2x256xf32> -> vector<2x256xf32>
    %c0_3 = arith.constant 0 : index
    %c0_4 = arith.constant 0 : index
    %4 = vector.load %arg3[%c0_3, %c0_4] : memref<1x256xf32, #tpu.memory_space<vmem>>, vector<1x256xf32>
    %5 = vector.broadcast %4 : vector<1x256xf32> to vector<2x256xf32>
    %6 = arith.addf %3, %5 : vector<2x256xf32>
    %cst_5 = arith.constant 0.000000e+00 : f32
    %7 = vector.broadcast %cst_5 : f32 to vector<2x256xf32>
    %8 = arith.cmpf oge, %6, %7 : vector<2x256xf32>
    %cst_6 = arith.constant 2.000000e-01 : f32
    %9 = vector.broadcast %cst_6 : f32 to vector<2x256xf32>
    %10 = arith.mulf %9, %6 : vector<2x256xf32>
    %11 = arith.select %8, %6, %10 : vector<2x256xi1>, vector<2x256xf32>
    %12 = arith.truncf %11 : vector<2x256xf32> to vector<2x256xbf16>
    %c0_7 = arith.constant 0 : index
    %c0_8 = arith.constant 0 : index
    %13 = vector.load %arg4[%c0_7, %c0_8] : memref<256x256xbf16, #tpu.memory_space<vmem>>, vector<256x256xbf16>
    %cst_9 = arith.constant dense<0.000000e+00> : vector<2x256xf32>
    %14 = tpu.matmul %12, %13, %cst_9 {dimension_numbers = #tpu.dot_dimension_numbers<[1], [0], [0], [1], [0, 0, 1, 1], [], []>} : vector<2x256xbf16>, vector<256x256xbf16>, vector<2x256xf32> -> vector<2x256xf32>
    %c0_10 = arith.constant 0 : index
    %c0_11 = arith.constant 0 : index
    %15 = vector.load %arg5[%c0_10, %c0_11] : memref<1x256xf32, #tpu.memory_space<vmem>>, vector<1x256xf32>
    %16 = vector.broadcast %15 : vector<1x256xf32> to vector<2x256xf32>
    %17 = arith.addf %14, %16 : vector<2x256xf32>
    %cst_12 = arith.constant 0.000000e+00 : f32
    %18 = vector.broadcast %cst_12 : f32 to vector<2x256xf32>
    %19 = arith.cmpf oge, %17, %18 : vector<2x256xf32>
    %cst_13 = arith.constant 2.000000e-01 : f32
    %20 = vector.broadcast %cst_13 : f32 to vector<2x256xf32>
    %21 = arith.mulf %20, %17 : vector<2x256xf32>
    %22 = arith.select %19, %17, %21 : vector<2x256xi1>, vector<2x256xf32>
    %c0_14 = arith.constant 0 : index
    %c0_15 = arith.constant 0 : index
    %23 = vector.load %arg6[%c0_14, %c0_15] : memref<1x256xf32, #tpu.memory_space<vmem>>, vector<1x256xf32>
    %cst_16 = arith.constant dense<0.000000e+00> : vector<1x2xf32>
    %24 = tpu.matmul %23, %22, %cst_16 {dimension_numbers = #tpu.dot_dimension_numbers<[1], [1], [0], [0], [0, 0, 1, 0], [], []>} : vector<1x256xf32>, vector<2x256xf32>, vector<1x2xf32> -> vector<1x2xf32>
    %c0_17 = arith.constant 0 : index
    %c0_18 = arith.constant 0 : index
    %25 = vector.load %arg7[%c0_17, %c0_18] : memref<1x1xf32, #tpu.memory_space<vmem>>, vector<1x1xf32>
    %26 = vector.broadcast %25 : vector<1x1xf32> to vector<1x2xf32>
    %27 = arith.addf %24, %26 : vector<1x2xf32>
    %c0_19 = arith.constant 0 : index
    %c0_20 = arith.constant 0 : index
    %28 = vector.load %arg8[%c0_19, %c0_20] : memref<1x2xf32, #tpu.memory_space<vmem>>, vector<1x2xf32>
    tpu.vector_store %arg8[%c0_19, %c0_20], %27 {strides = array<i32>} : memref<1x2xf32, #tpu.memory_space<vmem>>, vector<1x2xf32>,
    %29 = arith.negf %27 : vector<1x2xf32>
    %30 = math.exp %29 : vector<1x2xf32>
    %cst_21 = arith.constant 1.000000e+00 : f32
    %31 = vector.broadcast %cst_21 : f32 to vector<1x2xf32>
    %32 = arith.addf %31, %30 : vector<1x2xf32>
    %33 = arith.divf %31, %32 : vector<1x2xf32>
    %c0_22 = arith.constant 0 : index
    %c0_23 = arith.constant 0 : index
    %34 = vector.load %arg9[%c0_22, %c0_23] : memref<1x2xf32, #tpu.memory_space<vmem>>, vector<1x2xf32>
    tpu.vector_store %arg9[%c0_22, %c0_23], %33 {strides = array<i32>} : memref<1x2xf32, #tpu.memory_space<vmem>>, vector<1x2xf32>,
    return
  }
  func.func @transform_0(%arg0: i32) -> (i32, i32) {
    %c0_i32 = arith.constant 0 : i32
    %c0_i32_0 = arith.constant 0 : i32
    return %arg0, %c0_i32 : i32, i32
  }
  func.func @transform_1(%arg0: i32) -> (i32, i32) {
    %c0_i32 = arith.constant 0 : i32
    %c0_i32_0 = arith.constant 0 : i32
    %c0_i32_1 = arith.constant 0 : i32
    return %c0_i32, %c0_i32_0 : i32, i32
  }
  func.func @transform_2(%arg0: i32) -> (i32, i32) {
    %c0_i32 = arith.constant 0 : i32
    %c0_i32_0 = arith.constant 0 : i32
    %c0_i32_1 = arith.constant 0 : i32
    return %c0_i32, %c0_i32_0 : i32, i32
  }
  func.func @transform_3(%arg0: i32) -> (i32, i32) {
    %c0_i32 = arith.constant 0 : i32
    %c0_i32_0 = arith.constant 0 : i32
    %c0_i32_1 = arith.constant 0 : i32
    return %c0_i32, %c0_i32_0 : i32, i32
  }
  func.func @transform_4(%arg0: i32) -> (i32, i32) {
    %c0_i32 = arith.constant 0 : i32
    %c0_i32_0 = arith.constant 0 : i32
    %c0_i32_1 = arith.constant 0 : i32
    return %c0_i32, %c0_i32_0 : i32, i32
  }
  func.func @transform_5(%arg0: i32) -> (i32, i32) {
    %c0_i32 = arith.constant 0 : i32
    %c0_i32_0 = arith.constant 0 : i32
    %c0_i32_1 = arith.constant 0 : i32
    return %c0_i32, %c0_i32_0 : i32, i32
  }
  func.func @transform_6(%arg0: i32) -> (i32, i32) {
    %c0_i32 = arith.constant 0 : i32
    %c0_i32_0 = arith.constant 0 : i32
    %c0_i32_1 = arith.constant 0 : i32
    return %c0_i32, %c0_i32_0 : i32, i32
  }
  func.func @transform_7(%arg0: i32) -> (i32, i32) {
    %c0_i32 = arith.constant 0 : i32
    %c0_i32_0 = arith.constant 0 : i32
    return %c0_i32, %arg0 : i32, i32
  }
  func.func @transform_8(%arg0: i32) -> (i32, i32) {
    %c0_i32 = arith.constant 0 : i32
    %c0_i32_0 = arith.constant 0 : i32
    return %c0_i32, %arg0 : i32, i32
  }
}

</mosaic_0001>

<bundles_post_ra>
// kernel: tpu_custom_call.1
= control target key start
LH: loop header
LB: loop body
LE: loop exit
PB: predicated region body
PF: predicated region fallthrough
CT: control target
= control target key end

     0   :  { %s2169_s0 = inlined_call_operand.hbm [shape: f32[2,784], index: 0, kind: input, shape index: {}]   ;;  %s2170_s1 = inlined_call_operand.hbm [shape: bf16[784,256], index: 1, kind: input, shape index: {}]   ;;  %s2171_s2 = inlined_call_operand.vmem [shape: f32[1,256], index: 2, kind: input, shape index: {}]   ;;  %s2172_s3 = inlined_call_operand.hbm [shape: bf16[256,256], index: 3, kind: input, shape index: {}]   ;;  %s2173_s4 = inlined_call_operand.vmem [shape: f32[1,256], index: 4, kind: input, shape index: {}]   ;;  %s2174_s5 = inlined_call_operand.vmem [shape: f32[1,256], index: 5, kind: input, shape index: {}]   ;;  %s2175_s6 = inlined_call_operand.<no memory space> [shape: f32[1,1], index: 6, kind: input, shape index: {}]   ;;  %s2176_s7 = inlined_call_operand.hbm [shape: f32[1,2], index: 7, kind: output, shape index: {0}]   ;;  %s2177_s8 = inlined_call_operand.hbm [shape: f32[1,2], index: 8, kind: output, shape index: {1}]  }
   0x1   :  { %v14_v0 = vstv %s2175_s6 }
   0x2   :  { %15 = vst [vmem:[#allocation2] sm:$0x1] %v14_v0 }
   0x3   :  { %16 = vsyncpa [#allocation4], 0 }
   0x4   :  { %17 = vsyncpa [#allocation7], 0 }
   0x5   :  { %18 = vsyncpa [#allocation5], 0  ;;  %s35_s9 = sshll.u32 %s2170_s1, 4  ;;  %s36_s9 = int_to_ptr.hbm [resolvable:$true] %s35_s9 }
   0x6   :  { %19 = vsyncpa [#allocation11], 0  ;;  %s2053_s10 = smov [#allocation6]   ;;  %s25_s14 = sshll.u32 %s2169_s0, 4  ;;  %s26_s14 = int_to_ptr.hbm [resolvable:$true] %s25_s14 }
   0x7   :  { %s37_s11 = sshll.u32 %s2053_s10, 4  ;;  %s2054_s15 = smov 128   ;;  %s38_s11 = int_to_ptr.vmem [resolvable:$true] %s37_s11 }
   0x8   :  { %s2055_s16 = smov 8   ;;  %s2056_s6 = smov [#allocation3]  }
   0x9   :  { %43 = dma.hbm_to_vmem [thread:$0]  %s36_s9, 12544, %s38_s11, [#allocation7], %s2054_s15, %s2054_s15, %s2055_s16  }
   0xa   :  { %s27_s17 = sshll.u32 %s2056_s6, 4  ;;  %s50_s20 = sshll.u32 %s2172_s3, 4  ;;  %s28_s17 = int_to_ptr.vmem [resolvable:$true] %s27_s17  ;;  %s51_s20 = int_to_ptr.hbm [resolvable:$true] %s50_s20 }
   0xb   :  { %30 = dma.hbm_to_vmem [thread:$0]  %s26_s14, 224, %s28_s17, [#allocation4]  }
   0xc   :  { %s2057_s1 = smov [#allocation8]  }
   0xd   :  { %s52_s21 = sshll.u32 %s2057_s1, 4  ;;  %s53_s21 = int_to_ptr.vmem [resolvable:$true] %s52_s21 }
   0xe   :  { %58 = dma.hbm_to_vmem [thread:$0]  %s51_s20, 4096, %s53_s21, [#allocation7], %s2054_s15, %s2054_s15, %s2055_s16  }
   0xf   :  { %2045 = dma.done.wait [#allocation4], 224  }
  0x10   :  { %2046 = vsyncadd [#allocation4], 4294967072 }
  0x11   :  { %2047 = dma.done.wait [#allocation7], 16640  }
  0x12   :  { %2048 = vsyncadd [#allocation7], 4294950656  ;;  %v1317_v1 = vld [vmem:[#allocation6 + $0x70] sm:$0xf]  ;;  %v1797_v2 = vld [vmem:[#allocation6 + $0x74] sm:$0xf0] }
  0x13   :  { %v1445_v3 = vld [vmem:[#allocation6 + $0x170] sm:$0xf]  ;;  %v1318_v4 = vor.u32 %v1797_v2, %v1317_v1  ;;  %v1829_v5 = vld [vmem:[#allocation6 + $0x174] sm:$0xf0]  ;;  %v1309_v12 = vld [vmem:[#allocation6 + $0x60] sm:$0xf] }
  0x14   :  { %v1509_v6 = vld [vmem:[#allocation6 + $0x1f0] sm:$0xf]  ;;  %v1845_v7 = vld [vmem:[#allocation6 + $0x1f4] sm:$0xf0]  ;;  %v1446_v8 = vor.u32 %v1829_v5, %v1445_v3  ;;  %v1795_v14 = vld [vmem:[#allocation6 + $0x64] sm:$0xf0] }
  0x15   :  { %v1510_v9 = vor.u32 %v1845_v7, %v1509_v6  ;;  %v1381_v10 = vld [vmem:[#allocation6 + $0xf0] sm:$0xf]  ;;  %v1813_v11 = vld [vmem:[#allocation6 + $0xf4] sm:$0xf0]  ;;  %704 = vmatpush.bf16.msra.mxu0 %v1318_v4  ;;  %v1437_v15 = vld [vmem:[#allocation6 + $0x160] sm:$0xf]  ;;  %v1310_v17 = vor.u32 %v1795_v14, %v1309_v12 }
  0x16   :  { %v1382_v13 = vor.u32 %v1813_v11, %v1381_v10  ;;  %v1827_v16 = vld [vmem:[#allocation6 + $0x164] sm:$0xf0]  ;;  %730 = vmatpush.bf16.msra.mxu2 %v1446_v8  ;;  %v1501_v19 = vld [vmem:[#allocation6 + $0x1e0] sm:$0xf]  ;;  %v1301_v24 = vld [vmem:[#allocation6 + $0x50] sm:$0xf] }
  0x17   :  { %743 = vmatpush.bf16.msra.mxu3 %v1510_v9  ;;  %v1438_v18 = vor.u32 %v1827_v16, %v1437_v15  ;;  %v1843_v20 = vld [vmem:[#allocation6 + $0x1e4] sm:$0xf0]  ;;  %v1373_v21 = vld [vmem:[#allocation6 + $0xe0] sm:$0xf]  ;;  %v1793_v25 = vld [vmem:[#allocation6 + $0x54] sm:$0xf0] }
  0x18   :  { %717 = vmatpush.bf16.msra.mxu1 %v1382_v13  ;;  %v1502_v22 = vor.u32 %v1843_v20, %v1501_v19  ;;  %v1811_v23 = vld [vmem:[#allocation6 + $0xe4] sm:$0xf0]  ;;  %v1429_v27 = vld [vmem:[#allocation6 + $0x150] sm:$0xf]  ;;  %v1825_v28 = vld [vmem:[#allocation6 + $0x154] sm:$0xf0]  ;;  %v1302_v30 = vor.u32 %v1793_v25, %v1301_v24 }
  0x19   :  { %v1374_v26 = vor.u32 %v1811_v23, %v1373_v21  ;;  %v1493_v29 = vld [vmem:[#allocation6 + $0x1d0] sm:$0xf]  ;;  %705 = vmatpush.bf16.msra.mxu0 %v1310_v17  ;;  %v1841_v31 = vld [vmem:[#allocation6 + $0x1d4] sm:$0xf0]  ;;  %v1430_v34 = vor.u32 %v1825_v28, %v1429_v27  ;;  %v1293_v36 = vld [vmem:[#allocation6 + $0x40] sm:$0xf] }
  0x1a   :  { %v1365_v32 = vld [vmem:[#allocation6 + $0xd0] sm:$0xf]  ;;  %v1809_v33 = vld [vmem:[#allocation6 + $0xd4] sm:$0xf0]  ;;  %731 = vmatpush.bf16.msra.mxu2 %v1438_v18  ;;  %v1494_v35 = vor.u32 %v1841_v31, %v1493_v29  ;;  %v1791_v37 = vld [vmem:[#allocation6 + $0x44] sm:$0xf0] }
  0x1b   :  { %744 = vmatpush.bf16.msra.mxu3 %v1502_v22  ;;  %v1421_v38 = vld [vmem:[#allocation6 + $0x140] sm:$0xf]  ;;  %v1366_v39 = vor.u32 %v1809_v33, %v1365_v32  ;;  %v1823_v40 = vld [vmem:[#allocation6 + $0x144] sm:$0xf0]  ;;  %v1294_v45 = vor.u32 %v1791_v37, %v1293_v36  ;;  %v1285_v48 = vld [vmem:[#allocation6 + $0x30] sm:$0xf] }
  0x1c   :  { %718 = vmatpush.bf16.msra.mxu1 %v1374_v26  ;;  %v1485_v41 = vld [vmem:[#allocation6 + $0x1c0] sm:$0xf]  ;;  %v1839_v42 = vld [vmem:[#allocation6 + $0x1c4] sm:$0xf0]  ;;  %v1422_v46 = vor.u32 %v1823_v40, %v1421_v38  ;;  %v1789_v49 = vld [vmem:[#allocation6 + $0x34] sm:$0xf0] }
  0x1d   :  { %v1357_v43 = vld [vmem:[#allocation6 + $0xc0] sm:$0xf]  ;;  %v1807_v44 = vld [vmem:[#allocation6 + $0xc4] sm:$0xf0]  ;;  %706 = vmatpush.bf16.msra.mxu0 %v1302_v30  ;;  %v1486_v47 = vor.u32 %v1839_v42, %v1485_v41  ;;  %v1413_v50 = vld [vmem:[#allocation6 + $0x130] sm:$0xf]  ;;  %v1286_v57 = vor.u32 %v1789_v49, %v1285_v48 }
  0x1e   :  { %732 = vmatpush.bf16.msra.mxu2 %v1430_v34  ;;  %v1358_v51 = vor.u32 %v1807_v44, %v1357_v43  ;;  %v1821_v52 = vld [vmem:[#allocation6 + $0x134] sm:$0xf0]  ;;  %v1477_v53 = vld [vmem:[#allocation6 + $0x1b0] sm:$0xf]  ;;  %v1277_v60 = vld [vmem:[#allocation6 + $0x20] sm:$0xf] }
  0x1f   :  { %745 = vmatpush.bf16.msra.mxu3 %v1494_v35  ;;  %v1837_v54 = vld [vmem:[#allocation6 + $0x1b4] sm:$0xf0]  ;;  %v1349_v55 = vld [vmem:[#allocation6 + $0xb0] sm:$0xf]  ;;  %v1414_v58 = vor.u32 %v1821_v52, %v1413_v50  ;;  %v1787_v61 = vld [vmem:[#allocation6 + $0x24] sm:$0xf0] }
  0x20   :  { %719 = vmatpush.bf16.msra.mxu1 %v1366_v39  ;;  %v1805_v56 = vld [vmem:[#allocation6 + $0xb4] sm:$0xf0]  ;;  %v1478_v59 = vor.u32 %v1837_v54, %v1477_v53  ;;  %v1405_v62 = vld [vmem:[#allocation6 + $0x120] sm:$0xf]  ;;  %v1819_v0 = vld [vmem:[#allocation6 + $0x124] sm:$0xf0]  ;;  %v1278_v5 = vor.u32 %v1787_v61, %v1277_v60 }
  0x21   :  { %707 = vmatpush.bf16.msra.mxu0 %v1294_v45  ;;  %v1350_v63 = vor.u32 %v1805_v56, %v1349_v55  ;;  %v1469_v1 = vld [vmem:[#allocation6 + $0x1a0] sm:$0xf]  ;;  %v1835_v2 = vld [vmem:[#allocation6 + $0x1a4] sm:$0xf0]  ;;  %v1269_v6 = vld [vmem:[#allocation6 + $0x10] sm:$0xf]  ;;  %v1406_v8 = vor.u32 %v1819_v0, %v1405_v62 }
  0x22   :  { %733 = vmatpush.bf16.msra.mxu2 %v1422_v46  ;;  %v1341_v3 = vld [vmem:[#allocation6 + $0xa0] sm:$0xf]  ;;  %v1803_v4 = vld [vmem:[#allocation6 + $0xa4] sm:$0xf0]  ;;  %v1785_v7 = vld [vmem:[#allocation6 + $0x14] sm:$0xf0]  ;;  %v1470_v9 = vor.u32 %v1835_v2, %v1469_v1 }
  0x23   :  { %746 = vmatpush.bf16.msra.mxu3 %v1486_v47  ;;  %v1397_v10 = vld [vmem:[#allocation6 + $0x110] sm:$0xf]  ;;  %v1817_v11 = vld [vmem:[#allocation6 + $0x114] sm:$0xf0]  ;;  %v1342_v13 = vor.u32 %v1803_v4, %v1341_v3  ;;  %v1261_v17 = vld [vmem:[#allocation6] sm:$0xf]  ;;  %v1270_v20 = vor.u32 %v1785_v7, %v1269_v6 }
  0x24   :  { %720 = vmatpush.bf16.msra.mxu1 %v1358_v51  ;;  %v1461_v12 = vld [vmem:[#allocation6 + $0x190] sm:$0xf]  ;;  %v1833_v14 = vld [vmem:[#allocation6 + $0x194] sm:$0xf0]  ;;  %v1783_v18 = vld [vmem:[#allocation6 + $0x4] sm:$0xf0]  ;;  %v1398_v23 = vor.u32 %v1817_v11, %v1397_v10 }
  0x25   :  { %708 = vmatpush.bf16.msra.mxu0 %v1286_v57  ;;  %v1333_v15 = vld [vmem:[#allocation6 + $0x90] sm:$0xf]  ;;  %v1801_v16 = vld [vmem:[#allocation6 + $0x94] sm:$0xf0]  ;;  %v1389_v21 = vld [vmem:[#allocation6 + $0x100] sm:$0xf]  ;;  %v1462_v24 = vor.u32 %v1833_v14, %v1461_v12  ;;  %v1262_v35 = vor.u32 %v1783_v18, %v1261_v17 }
  0x26   :  { %734 = vmatpush.bf16.msra.mxu2 %v1414_v58  ;;  %v78_v19 = vld [vmem:[#allocation3] sm:$0xff]  ;;  %v1815_v22 = vld [vmem:[#allocation6 + $0x104] sm:$0xf0]  ;;  %v1453_v25 = vld [vmem:[#allocation6 + $0x180] sm:$0xf]  ;;  %v1334_v28 = vor.u32 %v1801_v16, %v1333_v15  ;;  %vm700_vm0 = vcmask 130048  }
  0x27   :  { %747 = vmatpush.bf16.msra.mxu3 %v1478_v59  ;;  %82 = vst [vmem:[#allocation1] ss:$4 sm:$0xff] %v78_v19  ;;  %v1831_v26 = vld [vmem:[#allocation6 + $0x184] sm:$0xf0]  ;;  %v1573_v27 = vld [vmem:[#allocation6 + $0x270] sm:$0xf]  ;;  %v1390_v39 = vor.u32 %v1815_v22, %v1389_v21 }
  0x28   :  { %721 = vmatpush.bf16.msra.mxu1 %v1350_v63  ;;  %v1861_v29 = vld [vmem:[#allocation6 + $0x274] sm:$0xf0]  ;;  %v1796_v30 = vld [vmem:[#allocation6 + $0x74] sm:$0xf]  ;;  %v1319_v31 = vld [vmem:[#allocation6 + $0x78] sm:$0xf0]  ;;  %v1454_v40 = vor.u32 %v1831_v26, %v1453_v25 }
  0x29   :  { %709 = vmatpush.bf16.msra.mxu0 %v1278_v5  ;;  %v1325_v32 = vld [vmem:[#allocation6 + $0x80] sm:$0xf]  ;;  %v1799_v33 = vld [vmem:[#allocation6 + $0x84] sm:$0xf0]  ;;  %v1637_v34 = vld [vmem:[#allocation6 + $0x2f0] sm:$0xf]  ;;  %v1574_v44 = vor.u32 %v1861_v29, %v1573_v27  ;;  %v1322_v45 = vor.u32 %v1796_v30, %v1319_v31 }
  0x2a   :  { %735 = vmatpush.bf16.msra.mxu2 %v1406_v8  ;;  %v1877_v36 = vld [vmem:[#allocation6 + $0x2f4] sm:$0xf0]  ;;  %v1645_v37 = vld [vmem:[#allocation6 + $0x300] sm:$0xf]  ;;  %v1879_v38 = vld [vmem:[#allocation6 + $0x304] sm:$0xf0]  ;;  %v1326_v49 = vor.u32 %v1799_v33, %v1325_v32 }
  0x2b   :  { %748 = vmatpush.bf16.msra.mxu3 %v1470_v9  ;;  %v1812_v41 = vld [vmem:[#allocation6 + $0xf4] sm:$0xf]  ;;  %v1383_v42 = vld [vmem:[#allocation6 + $0xf8] sm:$0xf0]  ;;  %v1565_v43 = vld [vmem:[#allocation6 + $0x260] sm:$0xf]  ;;  %v1646_v51 = vor.u32 %v1879_v38, %v1645_v37  ;;  %v1638_v54 = vor.u32 %v1877_v36, %v1637_v34 }
  0x2c   :  { %722 = vmatpush.bf16.msra.mxu1 %v1342_v13  ;;  %v1859_v46 = vld [vmem:[#allocation6 + $0x264] sm:$0xf0]  ;;  %v1794_v47 = vld [vmem:[#allocation6 + $0x64] sm:$0xf]  ;;  %v1311_v48 = vld [vmem:[#allocation6 + $0x68] sm:$0xf0]  ;;  %v1386_v57 = vor.u32 %v1812_v41, %v1383_v42 }
  0x2d   :  { %710 = vmatpush.bf16.msra.mxu0 %v1270_v20  ;;  %v1629_v55 = vld [vmem:[#allocation6 + $0x2e0] sm:$0xf]  ;;  %v1875_v58 = vld [vmem:[#allocation6 + $0x2e4] sm:$0xf0]  ;;  %v1566_v61 = vor.u32 %v1859_v46, %v1565_v43  ;;  %v1314_v62 = vor.u32 %v1794_v47, %v1311_v48  ;;  %v1810_v63 = vld [vmem:[#allocation6 + $0xe4] sm:$0xf] }
  0x2e   :  { %736 = vmatpush.bf16.msra.mxu2 %v1398_v23  ;;  %v87_v50 = vld.sshfl [vmem:[#allocation1 + $0x10] sm:$0xff pattern:$0x73625140]  ;;  %v85_v52 = vld.sshfl [vmem:[#allocation1] sm:$0xff pattern:$0x73625140]  ;;  %v1630_v7 = vor.u32 %v1875_v58, %v1629_v55 }
  0x2f   :  { %749 = vmatpush.bf16.msra.mxu3 %v1462_v24  ;;  %v2118_v53 = vpack.c.bf16 %v87_v50, %v87_v50  ;;  %v88_v56 = vld.sshfl [vmem:[#allocation1 + $0x18] sm:$0xff pattern:$0x73625140]  ;;  %v2120_v59 = vpack.c.bf16 %v85_v52, %v85_v52  ;;  %v86_v60 = vld.sshfl [vmem:[#allocation1 + $0x8] sm:$0xff pattern:$0x73625140] }
  0x30   :  { %723 = vmatpush.bf16.msra.mxu1 %v1334_v28  ;;  %v1375_v0 = vld [vmem:[#allocation6 + $0xe8] sm:$0xf0]  ;;  %v1557_v1 = vld [vmem:[#allocation6 + $0x250] sm:$0xf]  ;;  %v1857_v2 = vld [vmem:[#allocation6 + $0x254] sm:$0xf0]  ;;  %v2122_v5 = vpack.c.bf16 %v88_v56, %v88_v56  ;;  %v2124_v6 = vpack.c.bf16 %v86_v60, %v86_v60 }
  0x31   :  { %711 = vmatpush.bf16.msra.mxu0 %v1262_v35  ;;  %v1792_v3 = vld [vmem:[#allocation6 + $0x54] sm:$0xf]  ;;  %v1303_v4 = vld [vmem:[#allocation6 + $0x58] sm:$0xf0]  ;;  %v1378_v8 = vor.u32 %v1810_v63, %v1375_v0  ;;  %v1621_v9 = vld [vmem:[#allocation6 + $0x2d0] sm:$0xf]  ;;  %v1558_v11 = vor.u32 %v1857_v2, %v1557_v1 }
  0x32   :  { %737 = vmatpush.bf16.msra.mxu2 %v1390_v39  ;;  %v1873_v10 = vld [vmem:[#allocation6 + $0x2d4] sm:$0xf0]  ;;  %v1306_v12 = vor.u32 %v1792_v3, %v1303_v4  ;;  %v1808_v13 = vld [vmem:[#allocation6 + $0xd4] sm:$0xf]  ;;  %v1367_v14 = vld [vmem:[#allocation6 + $0xd8] sm:$0xf0] }
  0x33   :  { %750 = vmatpush.bf16.msra.mxu3 %v1454_v40  ;;  %v1549_v15 = vld [vmem:[#allocation6 + $0x240] sm:$0xf]  ;;  %v1855_v16 = vld [vmem:[#allocation6 + $0x244] sm:$0xf0]  ;;  %v1790_v17 = vld [vmem:[#allocation6 + $0x44] sm:$0xf]  ;;  %v1622_v19 = vor.u32 %v1873_v10, %v1621_v9  ;;  %v1370_v20 = vor.u32 %v1808_v13, %v1367_v14 }
  0x34   :  { %724 = vmatpush.bf16.msra.mxu1 %v1326_v49  ;;  %712 = vmatmul.bf16.vlgmr.msra.gmra.mxu0 %v2120_v59  ;;  %v1295_v18 = vld [vmem:[#allocation6 + $0x48] sm:$0xf0]  ;;  %v1613_v21 = vld [vmem:[#allocation6 + $0x2c0] sm:$0xf]  ;;  %v1871_v22 = vld [vmem:[#allocation6 + $0x2c4] sm:$0xf0]  ;;  %v1550_v23 = vor.u32 %v1855_v16, %v1549_v15 }
  0x35   :  { %756 = vmatpush.bf16.msrb.mxu0 %v1574_v44  ;;  %738 = vmatmul.bf16.vlgmr.msra.gmra.mxu2 %v2118_v53  ;;  %v1298_v24 = vor.u32 %v1790_v17, %v1295_v18  ;;  %v1806_v25 = vld [vmem:[#allocation6 + $0xc4] sm:$0xf]  ;;  %v1359_v26 = vld [vmem:[#allocation6 + $0xc8] sm:$0xf0]  ;;  %v1541_v27 = vld [vmem:[#allocation6 + $0x230] sm:$0xf]  ;;  %v1614_v31 = vor.u32 %v1871_v22, %v1613_v21 }
  0x36   :  { %789 = vmatpush.bf16.msrb.mxu2 %v1646_v51  ;;  %751 = vmatmul.bf16.vlgmr.msra.gmra.mxu3 %v2122_v5  ;;  %v1853_v28 = vld [vmem:[#allocation6 + $0x234] sm:$0xf0]  ;;  %v1788_v29 = vld [vmem:[#allocation6 + $0x34] sm:$0xf]  ;;  %v1287_v30 = vld [vmem:[#allocation6 + $0x38] sm:$0xf0]  ;;  %v1362_v33 = vor.u32 %v1806_v25, %v1359_v26 }
  0x37   :  { %795 = vmatpush.bf16.msrb.mxu3 %v1322_v45  ;;  %725 = vmatmul.bf16.vlgmr.msra.gmra.mxu1 %v2124_v6  ;;  %v1605_v32 = vld [vmem:[#allocation6 + $0x2b0] sm:$0xf]  ;;  %v1869_v34 = vld [vmem:[#allocation6 + $0x2b4] sm:$0xf0]  ;;  %v1804_v35 = vld [vmem:[#allocation6 + $0xb4] sm:$0xf]  ;;  %v1542_v37 = vor.u32 %v1853_v28, %v1541_v27  ;;  %v1290_v38 = vor.u32 %v1788_v29, %v1287_v30 }
  0x38   :  { %769 = vmatpush.bf16.msrb.mxu1 %v1638_v54  ;;  %v79_v36 = vld [vmem:[#allocation3 + $0x8] sm:$0x3f]  ;;  %v1533_v40 = vld [vmem:[#allocation6 + $0x220] sm:$0xf]  ;;  %v1851_v41 = vld [vmem:[#allocation6 + $0x224] sm:$0xf0]  ;;  %v1606_v44 = vor.u32 %v1869_v34, %v1605_v32 }
  0x39   :  { %757 = vmatpush.bf16.msrb.mxu0 %v1566_v61  ;;  %v1351_v39 = vld [vmem:[#allocation6 + $0xb8] sm:$0xf0]  ;;  %84 = vst [vmem:[#allocation1 + $0x20] ss:$4 sm:$0xff] %v79_v36  ;;  %v1786_v42 = vld [vmem:[#allocation6 + $0x24] sm:$0xf]  ;;  %v1534_v49 = vor.u32 %v1851_v41, %v1533_v40 }
  0x3a   :  { %808 = vmatpush.bf16.msra.mxu2 %v1386_v57  ;;  %v1279_v43 = vld [vmem:[#allocation6 + $0x28] sm:$0xf0]  ;;  %v1354_v45 = vor.u32 %v1804_v35, %v1351_v39  ;;  %v1597_v46 = vld [vmem:[#allocation6 + $0x2a0] sm:$0xf]  ;;  %v1867_v47 = vld [vmem:[#allocation6 + $0x2a4] sm:$0xf0] }
  0x3b   :  { %796 = vmatpush.bf16.msrb.mxu3 %v1314_v62  ;;  %v1802_v48 = vld [vmem:[#allocation6 + $0xa4] sm:$0xf]  ;;  %v1282_v50 = vor.u32 %v1786_v42, %v1279_v43  ;;  %v1343_v51 = vld [vmem:[#allocation6 + $0xa8] sm:$0xf0]  ;;  %v1525_v52 = vld [vmem:[#allocation6 + $0x210] sm:$0xf]  ;;  %v1598_v58 = vor.u32 %v1867_v47, %v1597_v46 }
  0x3c   :  { %770 = vmatpush.bf16.msrb.mxu1 %v1630_v7  ;;  %v1849_v54 = vld [vmem:[#allocation6 + $0x214] sm:$0xf0]  ;;  %v1784_v55 = vld [vmem:[#allocation6 + $0x14] sm:$0xf]  ;;  %v1271_v56 = vld [vmem:[#allocation6 + $0x18] sm:$0xf0]  ;;  %v1346_v63 = vor.u32 %v1802_v48, %v1343_v51 }
  0x3d   :  { %758 = vmatpush.bf16.msrb.mxu0 %v1558_v11  ;;  %v1589_v57 = vld [vmem:[#allocation6 + $0x290] sm:$0xf]  ;;  %v1865_v60 = vld [vmem:[#allocation6 + $0x294] sm:$0xf0]  ;;  %v1800_v61 = vld [vmem:[#allocation6 + $0x94] sm:$0xf]  ;;  %v1526_v2 = vor.u32 %v1849_v54, %v1525_v52  ;;  %v1274_v3 = vor.u32 %v1784_v55, %v1271_v56 }
  0x3e   :  { %809 = vmatpush.bf16.msra.mxu2 %v1378_v8  ;;  %v1335_v62 = vld [vmem:[#allocation6 + $0x98] sm:$0xf0]  ;;  %v1517_v0 = vld [vmem:[#allocation6 + $0x200] sm:$0xf]  ;;  %v1847_v4 = vld [vmem:[#allocation6 + $0x204] sm:$0xf0]  ;;  %v1590_v13 = vor.u32 %v1865_v60, %v1589_v57 }
  0x3f   :  { %797 = vmatpush.bf16.msrb.mxu3 %v1306_v12  ;;  %v1782_v8 = vld [vmem:[#allocation6 + $0x4] sm:$0xf]  ;;  %v1263_v9 = vld [vmem:[#allocation6 + $0x8] sm:$0xf0]  ;;  %v1828_v10 = vld [vmem:[#allocation6 + $0x174] sm:$0xf]  ;;  %v1338_v17 = vor.u32 %v1800_v61, %v1335_v62  ;;  %v1518_v21 = vor.u32 %v1847_v4, %v1517_v0 }
  0x40   :  { %771 = vmatpush.bf16.msrb.mxu1 %v1622_v19  ;;  %v91_v1 = vld.sshfl [vmem:[#allocation1 + $0x30] sm:$0xff pattern:$0x73625140]  ;;  %v1860_v12 = vld [vmem:[#allocation6 + $0x274] sm:$0xf]  ;;  %v1266_v22 = vor.u32 %v1782_v8, %v1263_v9  ;;  %s1232_s27 = sshll.u32 %s2176_s7, 4  ;;  %s1233_s27 = int_to_ptr.hbm [resolvable:$true] %s1232_s27 }
  0x41   :  { %759 = vmatpush.bf16.msrb.mxu0 %v1550_v23  ;;  %v2130_v7 = vpack.c.bf16 %v91_v1, %v91_v1  ;;  %v1447_v11 = vld [vmem:[#allocation6 + $0x178] sm:$0xf0]  ;;  %v1581_v15 = vld [vmem:[#allocation6 + $0x280] sm:$0xf]  ;;  %v1863_v16 = vld [vmem:[#allocation6 + $0x284] sm:$0xf0] }
  0x42   :  { %810 = vmatpush.bf16.msra.mxu2 %v1370_v20  ;;  %v1575_v14 = vld [vmem:[#allocation6 + $0x278] sm:$0xf0]  ;;  %v1798_v18 = vld [vmem:[#allocation6 + $0x84] sm:$0xf]  ;;  %v1327_v19 = vld [vmem:[#allocation6 + $0x88] sm:$0xf0]  ;;  %v1450_v25 = vor.u32 %v1828_v10, %v1447_v11  ;;  %v1582_v30 = vor.u32 %v1863_v16, %v1581_v15 }
  0x43   :  { %798 = vmatpush.bf16.msrb.mxu3 %v1298_v24  ;;  %v1844_v20 = vld [vmem:[#allocation6 + $0x1f4] sm:$0xf]  ;;  %v89_v23 = vld.sshfl [vmem:[#allocation1 + $0x20] sm:$0xff pattern:$0x73625140]  ;;  %v1578_v26 = vor.u32 %v1860_v12, %v1575_v14  ;;  %v1330_v34 = vor.u32 %v1798_v18, %v1327_v19  ;;  %vm1203_vm5 = vcmask 8192  }
  0x44   :  { %772 = vmatpush.bf16.msrb.mxu1 %v1614_v31  ;;  %v1511_v24 = vld [vmem:[#allocation6 + $0x1f8] sm:$0xf0]  ;;  %v1876_v27 = vld [vmem:[#allocation6 + $0x2f4] sm:$0xf]  ;;  %v1826_v29 = vld [vmem:[#allocation6 + $0x164] sm:$0xf] }
  0x45   :  { %760 = vmatpush.bf16.msrb.mxu0 %v1542_v37  ;;  %1651 = vmatmul.msk.bf16.vlgmr.msrb.gmra.mxu2 %vm700_vm0, %v2130_v7  ;;  %v1639_v28 = vld [vmem:[#allocation6 + $0x2f8] sm:$0xf0]  ;;  %v90_v31 = vld.sshfl [vmem:[#allocation1 + $0x28] sm:$0xff pattern:$0x73625140]  ;;  %v1514_v37 = vor.u32 %v1844_v20, %v1511_v24  ;;  %s2060_s7 = smov [#allocation10]  }
  0x46   :  { %811 = vmatpush.bf16.msra.mxu2 %v1362_v33  ;;  %v1439_v32 = vld [vmem:[#allocation6 + $0x168] sm:$0xf0]  ;;  %v2134_v33 = vpack.c.bf16 %v89_v23, %v89_v23  ;;  %v1858_v35 = vld [vmem:[#allocation6 + $0x264] sm:$0xf]  ;;  %v2136_v40 = vpack.c.bf16 %v90_v31, %v90_v31  ;;  %v1824_v46 = vld [vmem:[#allocation6 + $0x154] sm:$0xf] }
  0x47   :  { %799 = vmatpush.bf16.msrb.mxu3 %v1290_v38  ;;  %v1567_v36 = vld [vmem:[#allocation6 + $0x268] sm:$0xf0]  ;;  %v1642_v38 = vor.u32 %v1876_v27, %v1639_v28  ;;  %v1842_v39 = vld [vmem:[#allocation6 + $0x1e4] sm:$0xf]  ;;  %v1442_v41 = vor.u32 %v1826_v29, %v1439_v32  ;;  %v1431_v47 = vld [vmem:[#allocation6 + $0x158] sm:$0xf0] }
  0x48   :  { %773 = vmatpush.bf16.msrb.mxu1 %v1606_v44  ;;  %v1503_v42 = vld [vmem:[#allocation6 + $0x1e8] sm:$0xf0]  ;;  %v1874_v43 = vld [vmem:[#allocation6 + $0x2e4] sm:$0xf]  ;;  %v1856_v48 = vld [vmem:[#allocation6 + $0x254] sm:$0xf]  ;;  %v1434_v54 = vor.u32 %v1824_v46, %v1431_v47 }
  0x49   :  { %761 = vmatpush.bf16.msrb.mxu0 %v1534_v49  ;;  %v1631_v44 = vld [vmem:[#allocation6 + $0x2e8] sm:$0xf0]  ;;  %v1559_v49 = vld [vmem:[#allocation6 + $0x258] sm:$0xf0]  ;;  %v1840_v52 = vld [vmem:[#allocation6 + $0x1d4] sm:$0xf] }
  0x4a   :  { %812 = vmatpush.bf16.msra.mxu2 %v1354_v45  ;;  %v1570_v45 = vor.u32 %v1858_v35, %v1567_v36  ;;  %v1634_v51 = vor.u32 %v1874_v43, %v1631_v44  ;;  %v1495_v55 = vld [vmem:[#allocation6 + $0x1d8] sm:$0xf0]  ;;  %v1872_v56 = vld [vmem:[#allocation6 + $0x2d4] sm:$0xf]  ;;  %v1822_v60 = vld [vmem:[#allocation6 + $0x144] sm:$0xf] }
  0x4b   :  { %800 = vmatpush.bf16.msrb.mxu3 %v1282_v50  ;;  %v1506_v50 = vor.u32 %v1842_v39, %v1503_v42  ;;  %v1623_v57 = vld [vmem:[#allocation6 + $0x2d8] sm:$0xf0]  ;;  %v1423_v61 = vld [vmem:[#allocation6 + $0x148] sm:$0xf0]  ;;  %v1854_v62 = vld [vmem:[#allocation6 + $0x244] sm:$0xf]  ;;  %v1498_v0 = vor.u32 %v1840_v52, %v1495_v55 }
  0x4c   :  { %774 = vmatpush.bf16.msrb.mxu1 %v1598_v58  ;;  %v1562_v58 = vor.u32 %v1856_v48, %v1559_v49  ;;  %v1626_v1 = vor.u32 %v1872_v56, %v1623_v57  ;;  %v1487_v4 = vld [vmem:[#allocation6 + $0x1c8] sm:$0xf0]  ;;  %v1870_v8 = vld [vmem:[#allocation6 + $0x2c4] sm:$0xf]  ;;  %v1820_v11 = vld [vmem:[#allocation6 + $0x134] sm:$0xf] }
  0x4d   :  { %762 = vmatpush.bf16.msrb.mxu0 %v1526_v2  ;;  %v1838_v2 = vld [vmem:[#allocation6 + $0x1c4] sm:$0xf]  ;;  %v1615_v9 = vld [vmem:[#allocation6 + $0x2c8] sm:$0xf0]  ;;  %v1415_v12 = vld [vmem:[#allocation6 + $0x138] sm:$0xf0] }
  0x4e   :  { %813 = vmatpush.bf16.msra.mxu2 %v1346_v63  ;;  %v1551_v63 = vld [vmem:[#allocation6 + $0x248] sm:$0xf0]  ;;  %v1543_v14 = vld [vmem:[#allocation6 + $0x238] sm:$0xf0]  ;;  %v1618_v15 = vor.u32 %v1870_v8, %v1615_v9  ;;  %v1836_v16 = vld [vmem:[#allocation6 + $0x1b4] sm:$0xf] }
  0x4f   :  { %801 = vmatpush.bf16.msrb.mxu3 %v1274_v3  ;;  %v1426_v3 = vor.u32 %v1822_v60, %v1423_v61  ;;  %v1554_v10 = vor.u32 %v1854_v62, %v1551_v63  ;;  %v1479_v18 = vld [vmem:[#allocation6 + $0x1b8] sm:$0xf0]  ;;  %v1868_v19 = vld [vmem:[#allocation6 + $0x2b4] sm:$0xf]  ;;  %v1407_v23 = vld [vmem:[#allocation6 + $0x128] sm:$0xf0] }
  0x50   :  { %775 = vmatpush.bf16.msrb.mxu1 %v1590_v13  ;;  %v1852_v13 = vld [vmem:[#allocation6 + $0x234] sm:$0xf]  ;;  %v1607_v20 = vld [vmem:[#allocation6 + $0x2b8] sm:$0xf0]  ;;  %v1850_v24 = vld [vmem:[#allocation6 + $0x224] sm:$0xf] }
  0x51   :  { %763 = vmatpush.bf16.msrb.mxu0 %v1518_v21  ;;  %v1546_v21 = vor.u32 %v1852_v13, %v1543_v14  ;;  %v1834_v27 = vld [vmem:[#allocation6 + $0x1a4] sm:$0xf]  ;;  %v1471_v29 = vld [vmem:[#allocation6 + $0x1a8] sm:$0xf0]  ;;  %v1399_v35 = vld [vmem:[#allocation6 + $0x118] sm:$0xf0] }
  0x52   :  { %814 = vmatpush.bf16.msra.mxu2 %v1338_v17  ;;  %v1418_v17 = vor.u32 %v1820_v11, %v1415_v12  ;;  %v1599_v31 = vld [vmem:[#allocation6 + $0x2a8] sm:$0xf0]  ;;  %v1848_v36 = vld [vmem:[#allocation6 + $0x214] sm:$0xf]  ;;  %v1463_v43 = vld [vmem:[#allocation6 + $0x198] sm:$0xf0] }
  0x53   :  { %802 = vmatpush.bf16.msrb.mxu3 %v1266_v22  ;;  %v1818_v22 = vld [vmem:[#allocation6 + $0x124] sm:$0xf]  ;;  %v1864_v44 = vld [vmem:[#allocation6 + $0x294] sm:$0xf]  ;;  %v1391_v48 = vld [vmem:[#allocation6 + $0x108] sm:$0xf0] }
  0x54   :  { %776 = vmatpush.bf16.msrb.mxu1 %v1582_v30  ;;  %764 = vmatmul.bf16.vlgmr.msrb.gmra.mxu0 %v2134_v33  ;;  %v1410_v28 = vor.u32 %v1818_v22, %v1407_v23  ;;  %v1866_v30 = vld [vmem:[#allocation6 + $0x2a4] sm:$0xf]  ;;  %v1647_v52 = vld [vmem:[#allocation6 + $0x308] sm:$0xf0]  ;;  %v1703_v11 = vld [vmem:[#allocation8 + $0x60] sm:$0xf] }
  0x55   :  { %821 = vmatpush.bf16.msra.mxu0 %v1450_v25  ;;  %v1482_v25 = vor.u32 %v1836_v16, %v1479_v18  ;;  %v1602_v39 = vor.u32 %v1866_v30, %v1599_v31  ;;  %v1814_v47 = vld [vmem:[#allocation6 + $0x104] sm:$0xf]  ;;  %v1583_v62 = vld [vmem:[#allocation6 + $0x288] sm:$0xf0]  ;;  %v1892_v12 = vld [vmem:[#allocation8 + $0x64] sm:$0xf] }
  0x56   :  { %815 = vmatpush.bf16.msra.mxu2 %v1330_v34  ;;  %803 = vmatmul.bf16.vlgmr.msrb.gmra.mxu3 %v2120_v59  ;;  %v1490_v59 = vor.u32 %v1838_v2, %v1487_v4  ;;  %v1816_v34 = vld [vmem:[#allocation6 + $0x114] sm:$0xf]  ;;  %v1846_v49 = vld [vmem:[#allocation6 + $0x204] sm:$0xf]  ;;  %v1394_v56 = vor.u32 %v1814_v47, %v1391_v48  ;;  %v1711_v2 = vld [vmem:[#allocation8 + $0x70] sm:$0xf] }
  0x57   :  { %847 = vmatpush.bf16.msra.mxu3 %v1578_v26  ;;  %777 = vmatmul.bf16.vlgmr.msrb.gmra.mxu1 %v2136_v40  ;;  %v1610_v26 = vor.u32 %v1868_v19, %v1607_v20  ;;  %v1402_v42 = vor.u32 %v1816_v34, %v1399_v35  ;;  %v1830_v57 = vld [vmem:[#allocation6 + $0x184] sm:$0xf]  ;;  %v1713_v9 = vld [vmem:[#allocation8 + $0x78] sm:$0xf0]  ;;  %v1705_v13 = vld [vmem:[#allocation8 + $0x68] sm:$0xf0] }
  0x58   :  { %834 = vmatpush.bf16.msra.mxu1 %v1514_v37  ;;  %v1527_v37 = vld [vmem:[#allocation6 + $0x218] sm:$0xf0]  ;;  %v1862_v61 = vld [vmem:[#allocation6 + $0x284] sm:$0xf]  ;;  %v1708_v14 = vor.u32 %v1892_v12, %v1705_v13  ;;  %v1889_v18 = vld [vmem:[#allocation8 + $0x44] sm:$0xf0] }
  0x59   :  { %822 = vmatpush.bf16.msra.mxu0 %v1442_v41  ;;  %816 = vmatmul.bf16.vlgmr.msra.gmra.mxu2 %v2124_v6  ;;  %v1535_v6 = vld [vmem:[#allocation6 + $0x228] sm:$0xf0]  ;;  %v1832_v41 = vld [vmem:[#allocation6 + $0x194] sm:$0xf]  ;;  %v1530_v46 = vor.u32 %v1848_v36, %v1527_v37  ;;  %v1894_v8 = vld [vmem:[#allocation8 + $0x74] sm:$0xf] }
  0x5a   :  { %860 = vmatpush.bf16.msrb.mxu2 %v1642_v38  ;;  %v1538_v32 = vor.u32 %v1850_v24, %v1535_v6  ;;  %v1474_v38 = vor.u32 %v1834_v27, %v1471_v29  ;;  %v1888_v19 = vld [vmem:[#allocation8 + $0x44] sm:$0xf]  ;;  %v1689_v20 = vld [vmem:[#allocation8 + $0x48] sm:$0xf0]  ;;  %v1679_v23 = vld [vmem:[#allocation8 + $0x30] sm:$0xf] }
  0x5b   :  { %848 = vmatpush.bf16.msra.mxu3 %v1570_v45  ;;  %v1591_v45 = vld [vmem:[#allocation6 + $0x298] sm:$0xf0]  ;;  %v1692_v22 = vor.u32 %v1888_v19, %v1689_v20  ;;  %v1887_v24 = vld [vmem:[#allocation8 + $0x34] sm:$0xf0]  ;;  %v1886_v6 = vld [vmem:[#allocation8 + $0x34] sm:$0xf] }
  0x5c   :  { %835 = vmatpush.bf16.msra.mxu1 %v1506_v50  ;;  %v1519_v50 = vld [vmem:[#allocation6 + $0x208] sm:$0xf0]  ;;  %v1594_v55 = vor.u32 %v1864_v44, %v1591_v45  ;;  %v1885_v29 = vld [vmem:[#allocation8 + $0x24] sm:$0xf0]  ;;  %v1884_v30 = vld [vmem:[#allocation8 + $0x24] sm:$0xf] }
  0x5d   :  { %823 = vmatpush.bf16.msra.mxu0 %v1434_v54  ;;  %v1466_v54 = vor.u32 %v1832_v41, %v1463_v43  ;;  %v1522_v60 = vor.u32 %v1846_v49, %v1519_v50  ;;  %v1663_v35 = vld [vmem:[#allocation8 + $0x10] sm:$0xf]  ;;  %v1883_v36 = vld [vmem:[#allocation8 + $0x14] sm:$0xf0]  ;;  %v1882_v37 = vld [vmem:[#allocation8 + $0x14] sm:$0xf] }
  0x5e   :  { %861 = vmatpush.bf16.msrb.mxu2 %v1634_v51  ;;  %v1878_v51 = vld [vmem:[#allocation6 + $0x304] sm:$0xf]  ;;  %v1665_v41 = vld [vmem:[#allocation8 + $0x18] sm:$0xf0]  ;;  %v1655_v44 = vld [vmem:[#allocation8] sm:$0xf] }
  0x5f   :  { %849 = vmatpush.bf16.msra.mxu3 %v1562_v58  ;;  %v1455_v58 = vld [vmem:[#allocation6 + $0x188] sm:$0xf0]  ;;  %v1650_v63 = vor.u32 %v1878_v51, %v1647_v52  ;;  %v1881_v45 = vld [vmem:[#allocation8 + $0x4] sm:$0xf0]  ;;  %v1657_v48 = vld [vmem:[#allocation8 + $0x8] sm:$0xf0] }
  0x60   :  { %836 = vmatpush.bf16.msra.mxu1 %v1498_v0  ;;  %v1458_v0 = vor.u32 %v1830_v57, %v1455_v58  ;;  %v1656_v47 = vor.u32 %v1881_v45, %v1655_v44  ;;  %v2151_v51 = vld [vmem:[%s2171_s2] sm:$0x3]  ;;  %v1910_v58 = vld [vmem:[#allocation8 + $0xf4] sm:$0xf]  ;;  %v1904_v19 = vld [vmem:[#allocation8 + $0xc4] sm:$0xf] }
  0x61   :  { %824 = vmatpush.bf16.msra.mxu0 %v1426_v3  ;;  %v1895_v3 = vld [vmem:[#allocation8 + $0x74] sm:$0xf0]  ;;  %s1241_s28 = sshll.u32 %s2060_s7, 4  ;;  %s1243_s9 = sshll.u32 %s2177_s8, 4  ;;  %s1242_s28 = int_to_ptr.vmem [resolvable:$true] %s1241_s28  ;;  %s1244_s9 = int_to_ptr.hbm [resolvable:$true] %s1243_s9 }
  0x62   :  { %862 = vmatpush.bf16.msrb.mxu2 %v1626_v1  ;;  %v1586_v1 = vor.u32 %v1862_v61, %v1583_v62  ;;  %v1712_v4 = vor.u32 %v1895_v3, %v1711_v2  ;;  %v1911_v57 = vld [vmem:[#allocation8 + $0xf4] sm:$0xf0]  ;;  %v1777_v62 = vld [vmem:[#allocation8 + $0xf8] sm:$0xf0]  ;;  %v1909_v2 = vld [vmem:[#allocation8 + $0xe4] sm:$0xf0] }
  0x63   :  { %850 = vmatpush.bf16.msra.mxu3 %v1554_v10  ;;  %v1716_v10 = vor.u32 %v1894_v8, %v1713_v9  ;;  %v1908_v3 = vld [vmem:[#allocation8 + $0xe4] sm:$0xf]  ;;  %v1769_v9 = vld [vmem:[#allocation8 + $0xe8] sm:$0xf0]  ;;  %v1907_v13 = vld [vmem:[#allocation8 + $0xd4] sm:$0xf0] }
  0x64   :  { %837 = vmatpush.bf16.msra.mxu1 %v1490_v59  ;;  %v1891_v59 = vld [vmem:[#allocation8 + $0x54] sm:$0xf0] }
  0x65   :  { %825 = vmatpush.bf16.msra.mxu0 %v1418_v17  ;;  %v1687_v17 = vld [vmem:[#allocation8 + $0x40] sm:$0xf] }
  0x66   :  { %863 = vmatpush.bf16.msrb.mxu2 %v1618_v15 }
  0x67   :  { %851 = vmatpush.bf16.msra.mxu3 %v1546_v21  ;;  %v1688_v21 = vor.u32 %v1889_v18, %v1687_v17  ;;  %v1751_v17 = vld [vmem:[#allocation8 + $0xc0] sm:$0xf]  ;;  %v1905_v18 = vld [vmem:[#allocation8 + $0xc4] sm:$0xf0] }
  0x68   :  { %838 = vmatpush.bf16.msra.mxu1 %v1482_v25  ;;  %v1681_v25 = vld [vmem:[#allocation8 + $0x38] sm:$0xf0] }
  0x69   :  { %826 = vmatpush.bf16.msra.mxu0 %v1410_v28  ;;  %v1684_v27 = vor.u32 %v1886_v6, %v1681_v25  ;;  %v1671_v28 = vld [vmem:[#allocation8 + $0x20] sm:$0xf]  ;;  %v1743_v25 = vld [vmem:[#allocation8 + $0xb0] sm:$0xf] }
  0x6a   :  { %864 = vmatpush.bf16.msrb.mxu2 %v1610_v26  ;;  %v1680_v26 = vor.u32 %v1887_v24, %v1679_v23  ;;  %v1672_v31 = vor.u32 %v1885_v29, %v1671_v28 }
  0x6b   :  { %852 = vmatpush.bf16.msra.mxu3 %v1538_v32  ;;  %v1673_v32 = vld [vmem:[#allocation8 + $0x28] sm:$0xf0] }
  0x6c   :  { %839 = vmatpush.bf16.msra.mxu1 %v1474_v38  ;;  %v1676_v34 = vor.u32 %v1884_v30, %v1673_v32 }
  0x6d   :  { %827 = vmatpush.bf16.msra.mxu0 %v1402_v42  ;;  %v1668_v42 = vor.u32 %v1882_v37, %v1665_v41  ;;  %v1901_v37 = vld [vmem:[#allocation8 + $0xa4] sm:$0xf0] }
  0x6e   :  { %865 = vmatpush.bf16.msrb.mxu2 %v1602_v39  ;;  %v1664_v39 = vor.u32 %v1883_v36, %v1663_v35  ;;  %v1735_v36 = vld [vmem:[#allocation8 + $0xa0] sm:$0xf] }
  0x6f   :  { %853 = vmatpush.bf16.msra.mxu3 %v1530_v46  ;;  %v1880_v46 = vld [vmem:[#allocation8 + $0x4] sm:$0xf]  ;;  %v1736_v41 = vor.u32 %v1901_v37, %v1735_v36 }
  0x70   :  { %840 = vmatpush.bf16.msra.mxu1 %v1466_v54  ;;  %v1660_v50 = vor.u32 %v1880_v46, %v1657_v48  ;;  %v1899_v48 = vld [vmem:[#allocation8 + $0x94] sm:$0xf0] }
  0x71   :  { %828 = vmatpush.bf16.msra.mxu0 %v1394_v56  ;;  %v1775_v56 = vld [vmem:[#allocation8 + $0xf0] sm:$0xf] }
  0x72   :  { %866 = vmatpush.bf16.msrb.mxu2 %v1594_v55  ;;  %v1776_v61 = vor.u32 %v1911_v57, %v1775_v56  ;;  %v1719_v56 = vld [vmem:[#allocation8 + $0x80] sm:$0xf]  ;;  %v1897_v57 = vld [vmem:[#allocation8 + $0x84] sm:$0xf0] }
  0x73   :  { %854 = vmatpush.bf16.msra.mxu3 %v1522_v60  ;;  %v206_v60 = vperm.slane %v2151_v51, 0 }
  0x74   :  { %841 = vmatpush.bf16.msra.mxu1 %v1458_v0  ;;  %829 = vmatmul.bf16.vlgmr.msra.gmra.mxu0 %v2118_v53  ;;  %v1893_v53 = vld [vmem:[#allocation8 + $0x64] sm:$0xf0] }
  0x75   :  { %880 = vmatpush.bf16.msrb.mxu0 %v1650_v63  ;;  %v1780_v63 = vor.u32 %v1910_v58, %v1777_v62  ;;  %v1896_v58 = vld [vmem:[#allocation8 + $0x84] sm:$0xf] }
  0x76   :  { %855 = vmatmul.bf16.vlgmr.msra.gmra.mxu3 %v2134_v33  ;;  %867 = vmatpush.bf16.msrb.mxu2 %v1586_v1  ;;  %v1704_v33 = vor.u32 %v1893_v53, %v1703_v11  ;;  %v1767_v1 = vld [vmem:[#allocation8 + $0xe0] sm:$0xf]  ;;  %v1772_v11 = vor.u32 %v1908_v3, %v1769_v9 }
  0x77   :  { %842 = vmatmul.bf16.vlgmr.msra.gmra.mxu1 %v2122_v5  ;;  %v1695_v5 = vld [vmem:[#allocation8 + $0x50] sm:$0xf]  ;;  %1105 = vmatpush.bf16.msrb.mxu3 %v1776_v61  ;;  %v1768_v8 = vor.u32 %v1909_v2, %v1767_v1  ;;  %v1721_v61 = vld [vmem:[#allocation8 + $0x88] sm:$0xf0]  ;;  %v207_v1 = vperm.slane %v2151_v51, 1 }
  0x78   :  { %1092 = vmatpush.bf16.msrb.mxu1 %v1712_v4  ;;  %v1696_v15 = vor.u32 %v1891_v59, %v1695_v5 }
  0x79   :  { %868 = vmatmul.bf16.vlgmr.msrb.gmra.mxu2 %v2136_v40  ;;  %1118 = vmatpush.bf16.msra.mxu0 %v1716_v10  ;;  %v1890_v40 = vld [vmem:[#allocation8 + $0x54] sm:$0xf] }
  0x7a   :  { %1131 = vmatpush.bf16.msra.mxu2 %v1780_v63  ;;  %v1724_v63 = vor.u32 %v1896_v58, %v1721_v61 }
  0x7b   :  { %1106 = vmatpush.bf16.msrb.mxu3 %v1768_v8 }
  0x7c   :  { %1093 = vmatpush.bf16.msrb.mxu1 %v1704_v33  ;;  %v1759_v33 = vld [vmem:[#allocation8 + $0xd0] sm:$0xf] }
  0x7d   :  { %1119 = vmatpush.bf16.msra.mxu0 %v1708_v14  ;;  %v1906_v14 = vld [vmem:[#allocation8 + $0xd4] sm:$0xf]  ;;  %v1760_v59 = vor.u32 %v1907_v13, %v1759_v33 }
  0x7e   :  { %1132 = vmatpush.bf16.msra.mxu2 %v1772_v11 }
  0x7f   :  { %1107 = vmatpush.bf16.msrb.mxu3 %v1760_v59 }
  0x80   :  { %1094 = vmatpush.bf16.msrb.mxu1 %v1696_v15 }
  0x84   :  { %1652 = vmatmul.msk.bf16.vlgmr.msrb.gmra.mxu0 %vm700_vm0, %v2130_v7  ;;  %v1697_v7 = vld [vmem:[#allocation8 + $0x58] sm:$0xf0]  ;;  %1095 = vmatpush.bf16.msrb.mxu1 %v1688_v21  ;;  %v1752_v21 = vor.u32 %v1905_v18, %v1751_v17 }
  0x85   :  { %v1700_v16 = vor.u32 %v1890_v40, %v1697_v7  ;;  %v1761_v40 = vld [vmem:[#allocation8 + $0xd8] sm:$0xf0] }
  0x86   :  { %v1764_v15 = vor.u32 %v1906_v14, %v1761_v40  ;;  %1108 = vmatpush.bf16.msrb.mxu3 %v1752_v21 }
  0x87   :  { %1120 = vmatpush.bf16.msra.mxu0 %v1700_v16 }
  0x88   :  { %1096 = vmatpush.bf16.msrb.mxu1 %v1680_v26  ;;  %1133 = vmatpush.bf16.msra.mxu2 %v1764_v15  ;;  %v1903_v26 = vld [vmem:[#allocation8 + $0xb4] sm:$0xf0] }
  0x89   :  { %v1744_v30 = vor.u32 %v1903_v26, %v1743_v25 }
  0x8b   :  { %1121 = vmatpush.bf16.msra.mxu0 %v1692_v22  ;;  %v1753_v22 = vld [vmem:[#allocation8 + $0xc8] sm:$0xf0]  ;;  %1109 = vmatpush.bf16.msrb.mxu3 %v1744_v30 }
  0x8c   :  { %1097 = vmatpush.bf16.msrb.mxu1 %v1672_v31  ;;  %v1756_v24 = vor.u32 %v1904_v19, %v1753_v22  ;;  %v1745_v31 = vld [vmem:[#allocation8 + $0xb8] sm:$0xf0]  ;;  %v1151_v22 = vld [vmem:[#allocation2] sm:$0x1] }
  0x8e   :  { %1134 = vmatpush.bf16.msra.mxu2 %v1756_v24  ;;  %v926_v24 = vld [vmem:[%s2173_s4] sm:$0x3]  ;;  %s2059_s4 = smov [#allocation9]  }
  0x8f   :  { %1122 = vmatpush.bf16.msra.mxu0 %v1684_v27  ;;  %v1902_v27 = vld [vmem:[#allocation8 + $0xb4] sm:$0xf]  ;;  %1110 = vmatpush.bf16.msrb.mxu3 %v1736_v41  ;;  %v929_v25 = vperm.slane %v926_v24, 1 }
  0x90   :  { %1098 = vmatpush.bf16.msrb.mxu1 %v1664_v39  ;;  %v1748_v32 = vor.u32 %v1902_v27, %v1745_v31 }
  0x92   :  { %1135 = vmatpush.bf16.msra.mxu2 %v1748_v32  ;;  %v1150_v32 = vld [vmem:[%s2174_s5] sm:$0x3]  ;;  %s1230_s5 = sshll.u32 %s2059_s4, 4  ;;  %s1231_s5 = int_to_ptr.vmem [resolvable:$true] %s1230_s5 }
  0x93   :  { %1123 = vmatpush.bf16.msra.mxu0 %v1676_v34 }
  0x94   :  { %1099 = vmatpush.bf16.msrb.mxu1 %v1656_v47  ;;  %v1727_v47 = vld [vmem:[#allocation8 + $0x90] sm:$0xf] }
  0x97   :  { %1124 = vmatpush.bf16.msra.mxu0 %v1668_v42  ;;  %v1737_v42 = vld [vmem:[#allocation8 + $0xa8] sm:$0xf0] }
  0x9b   :  { %1125 = vmatpush.bf16.msra.mxu0 %v1660_v50 }
  0xb1   :  { %v713_v38 = vpop.f32.mrf.mxu0 }
  0xb2   :  { %v714_v4 = vadd.f32 %v713_v38, %v206_v60  ;;  %v1900_v38 = vld [vmem:[#allocation8 + $0xa4] sm:$0xf]  ;;  %v1720_v60 = vor.u32 %v1897_v57, %v1719_v56 }
  0xb3   :  { %v1740_v46 = vor.u32 %v1900_v38, %v1737_v42  ;;  %v1160_v38 = vperm.slane %v1150_v32, 1 }
  0xb4   :  { %v726_v43 = vpop.f32.mrf.mxu1 }
  0xb5   :  { %v727_v53 = vadd.f32 %v726_v43, %v714_v4  ;;  %1136 = vmatpush.bf16.msra.mxu2 %v1740_v46 }
  0xb8   :  { %v739_v49 = vpop.f32.mrf.mxu2 }
  0xb9   :  { %v752_v52 = vpop.f32.mrf.mxu3  ;;  %v715_v54 = vpop.f32.mrf.mxu0  ;;  %v740_v12 = vadd.f32 %v739_v49, %v727_v53  ;;  %v1898_v49 = vld [vmem:[#allocation8 + $0x94] sm:$0xf] }
  0xba   :  { %v1729_v54 = vld [vmem:[#allocation8 + $0x98] sm:$0xf0] }
  0xbb   :  { %v753_v7 = vadd.f32 %v752_v52, %v740_v12  ;;  %v1728_v52 = vor.u32 %v1899_v48, %v1727_v47 }
  0xbc   :  { %v728_v55 = vpop.f32.mrf.mxu1 }
  0xbd   :  { %v1732_v55 = vor.u32 %v1898_v49, %v1729_v54  ;;  %1111 = vmatpush.bf16.msrb.mxu3 %v1728_v52 }
  0xbf   :  { %1137 = vmatpush.bf16.msra.mxu2 %v1732_v55 }
  0xc0   :  { %v741_v0 = vpop.f32.mrf.mxu2 }
  0xc1   :  { %v754_v10 = vpop.f32.mrf.mxu3  ;;  %1112 = vmatpush.bf16.msrb.mxu3 %v1720_v60 }
  0xc3   :  { %1138 = vmatpush.bf16.msra.mxu2 %v1724_v63 }
  0xc8   :  { %v791_v5 = vpop.f32.mrf.mxu2 }
  0xd0   :  { %v793_v29 = vpop.f32.mrf.mxu2 }
  0xd1   :  { %v765_v16 = vpop.f32.mrf.mxu0 }
  0xd2   :  { %v766_v20 = vadd.f32 %v765_v16, %v753_v7 }
  0xd4   :  { %v778_v23 = vpop.f32.mrf.mxu1 }
  0xd5   :  { %v779_v6 = vadd.f32 %v778_v23, %v766_v20  ;;  %v2058_v23 = vmov 0  }
  0xd6   :  { %1920 = vset.pattern.permute.xlu0 %v2058_v23 }
  0xd7   :  { %v792_v28 = vadd.f32 %v791_v5, %v779_v6  ;;  %1154 = vperm.xlu0 %1920, %v1151_v22   ;;  %v928_v6 = vperm.slane %v926_v24, 0 }
  0xd9   :  { %vm886_vm1 = vcmp.ge.f32.partialorder %v792_v28, 0.0  ;;  %v888_v34 = vmul.f32 0.2, %v792_v28  ;;  %v767_v35 = vpop.f32.mrf.mxu0  ;;  %v804_v44 = vpop.f32.mrf.mxu3 }
  0xda   :  { %v805_v2 = vadd.f32 %v804_v44, %v207_v1 }
  0xdb   :  { %v890_v39 = vsel %vm886_vm1, %v792_v28, %v888_v34 }
  0xdc   :  { %v892_v43 = vpack.c.bf16 %v890_v39, %v890_v39  ;;  %v780_v45 = vpop.f32.mrf.mxu1  ;;  %v817_v50 = vpop.f32.mrf.mxu2  ;;  %v1159_v39 = vperm.slane %v1150_v32, 0 }
  0xdd   :  { %v818_v4 = vadd.f32 %v817_v50, %v805_v2 }
  0xde   :  { %1100 = vmatmul.bf16.vlgmr.msrb.gmra.mxu1 %v892_v43  ;;  %1126 = vmatmul.bf16.vlgmr.msra.gmra.mxu0 %v892_v43 }
  0xe1   :  { %v806_v62 = vpop.f32.mrf.mxu3 }
  0xe4   :  { %v819_v0 = vpop.f32.mrf.mxu2 }
  0xf1   :  { %v830_v3 = vpop.f32.mrf.mxu0 }
  0xf2   :  { %v831_v9 = vadd.f32 %v830_v3, %v818_v4 }
  0xf4   :  { %v843_v8 = vpop.f32.mrf.mxu1 }
  0xf5   :  { %v844_v53 = vadd.f32 %v843_v8, %v831_v9 }
  0xf9   :  { %v856_v10 = vpop.f32.mrf.mxu3  ;;  %v832_v11 = vpop.f32.mrf.mxu0 }
  0xfa   :  { %v857_v33 = vadd.f32 %v856_v10, %v844_v53 }
  0xfc   :  { %v869_v12 = vpop.f32.mrf.mxu2  ;;  %v845_v13 = vpop.f32.mrf.mxu1 }
  0xfd   :  { %v870_v14 = vadd.f32 %v869_v12, %v857_v33 }
 0x101   :  { %v858_v5 = vpop.f32.mrf.mxu3  ;;  %v882_v59 = vpop.f32.mrf.mxu0 }
 0x102   :  { %v883_v40 = vadd.f32 %v882_v59, %v870_v14 }
 0x104   :  { %v871_v15 = vpop.f32.mrf.mxu2  ;;  %vm887_vm2 = vcmp.ge.f32.partialorder %v883_v40, 0.0  ;;  %v889_v7 = vmul.f32 0.2, %v883_v40 }
 0x106   :  { %v891_v16 = vsel %vm887_vm2, %v883_v40, %v889_v7 }
 0x107   :  { %v893_v51 = vpack.c.bf16 %v891_v16, %v891_v16 }
 0x109   :  { %v884_v17 = vpop.f32.mrf.mxu0  ;;  %1113 = vmatmul.bf16.vlgmr.msrb.gmra.mxu3 %v893_v51  ;;  %1139 = vmatmul.bf16.vlgmr.msra.gmra.mxu2 %v893_v51 }
 0x149   :  { %v1155_v43 = vpop.permute.xlu0 %1154 }
 0x14a   :  { %v1157_v44 = vperm.slane %v1155_v43, 0 }
 0x15b   :  { %v1101_v18 = vpop.f32.mrf.mxu1  ;;  %v1127_v19 = vpop.f32.mrf.mxu0 }
 0x15c   :  { %v1102_v26 = vadd.f32 %v1101_v18, %v928_v6  ;;  %v1128_v27 = vadd.f32 %v1127_v19, %v929_v25 }
 0x163   :  { %v1103_v20 = vpop.f32.mrf.mxu1  ;;  %v1129_v21 = vpop.f32.mrf.mxu0 }
 0x18c   :  { %v1114_v28 = vpop.f32.mrf.mxu3  ;;  %v1140_v29 = vpop.f32.mrf.mxu2 }
 0x18d   :  { %v1115_v30 = vadd.f32 %v1114_v28, %v1102_v26  ;;  %v1141_v31 = vadd.f32 %v1140_v29, %v1128_v27 }
 0x18f   :  { %vm1144_vm3 = vcmp.ge.f32.partialorder %v1115_v30, 0.0  ;;  %v1146_v34 = vmul.f32 0.2, %v1115_v30  ;;  %vm1145_vm4 = vcmp.ge.f32.partialorder %v1141_v31, 0.0  ;;  %v1147_v35 = vmul.f32 0.2, %v1141_v31 }
 0x191   :  { %v1148_v36 = vsel %vm1144_vm3, %v1115_v30, %v1146_v34  ;;  %v1149_v37 = vsel %vm1145_vm4, %v1141_v31, %v1147_v35 }
 0x192   :  { %1178 = vmatpush.xpose.msra.mxu1 %v1148_v36  ;;  %1198 = vmatpush.xpose.msra.mxu3 %v1149_v37 }
 0x194   :  { %v1116_v41 = vpop.f32.mrf.mxu3  ;;  %v1142_v42 = vpop.f32.mrf.mxu2 }
 0x195   :  { %1199 = vmatmul.f32.vlgmr.msra.gmra.mxu3 %v1160_v38  ;;  %1179 = vmatmul.f32.vlgmr.msra.gmra.mxu1 %v1159_v39 }
 0x212   :  { %v1180_v45 = vpop.f32.mrf.mxu1 }
 0x213   :  { %v1181_v46 = vadd.f32 %v1180_v45, %v1157_v44 }
 0x218   :  { %v1200_v47 = vpop.f32.mrf.mxu3 }
 0x219   :  { %v1201_v48 = vadd.f32 %v1200_v47, %v1181_v46 }
 0x21b   :  { %v1781_v49 = vmul.f32 -1.442695, %v1201_v48  ;;  %1204 = vst.msk [vmem:[#allocation9] sm:$0x1] %vm1203_vm5, %v1201_v48 }
 0x21c   :  { %1235 = dma.vmem_to_hbm [thread:$0]  %s1231_s5, 16, %s1233_s27, [#allocation5]  }
 0x21d   :  { %1921 = vpow2.f32 %v1781_v49 }
 0x223   :  { %v1922_v50 = vpop.eup %1921 }
 0x224   :  { %v1208_v52 = vadd.f32 1.0, %v1922_v50 }
 0x226   :  { %1923 = vrcp.f32 %v1208_v52  ;;  %v1220_v57 = vand.u32 2147483648, %v1208_v52  ;;  %v1218_v60 = vand.u32 2147483647, %v1208_v52  ;;  %vm1214_vm7 = vweird.f32 %v1208_v52 }
 0x228   :  { %v1221_v62 = vor.u32 1.1754944e-38, %v1220_v57  ;;  %vm1219_vm9 = vcmp.eq.f32.partialorder %v1218_v60, 8.507059e+37 }
 0x22c   :  { %v1924_v54 = vpop.eup %1923 }
 0x22d   :  { %v1210_v55 = vmul.f32 %v1924_v54, %v1208_v52  ;;  %vm1215_vm6 = vweird.f32 %v1924_v54 }
 0x22e   :  { %vm1216_vm8 = vmor %vm1214_vm7, %vm1215_vm6 }
 0x22f   :  { %v1211_v56 = vsub.f32 1.0, %v1210_v55 }
 0x231   :  { %v1212_v58 = vmul.f32 %v1924_v54, %v1211_v56 }
 0x233   :  { %v1213_v61 = vadd.f32 %v1924_v54, %v1212_v58 }
 0x235   :  { %v1217_v63 = vsel %vm1216_vm8, %v1924_v54, %v1213_v61 }
 0x236   :  { %v1222_v0 = vsel %vm1219_vm9, %v1221_v62, %v1217_v63 }
 0x237   :  { %1224 = vst.msk [vmem:[#allocation10] sm:$0x1] %vm1203_vm5, %v1222_v0 }
 0x238   :  { %1246 = dma.vmem_to_hbm [thread:$0]  %s1242_s28, 16, %s1244_s9, [#allocation11]  }
 0x239   :  { %2049 = dma.done.wait [#allocation5], 16  }
 0x23a   :  { %2050 = vsyncadd [#allocation5], 4294967280 }
 0x23b   :  { %2051 = dma.done.wait [#allocation11], 16  }
 0x23c   :  { %2052 = vsyncadd [#allocation11], 4294967280 }
 0x23d   :  { %1255 = vsyncpa [#allocation4], 1 }
 0x23e   :  { %1256 = vsyncpa [#allocation7], 1 }
 0x23f   :  { %1257 = vsyncpa [#allocation5], 1 }
 0x240   :  { %1258 = vsyncpa [#allocation11], 1 }

</bundles_post_ra>
